<compile_context>
chip_gen: v6e
topology: v6e:2x2x1
jax: 0.10.0
libtpu: 0.0.40
codegen_flags: <defaults>
</compile_context>

<pallas_src>
import functools
import math

import jax
import jax.numpy as jnp
from jax import lax
from jax.experimental import pallas as pl
from jax.experimental.pallas import tpu as pltpu


def _leaky(x):                       # nn.LeakyReLU(0.1)
    return jnp.where(x > 0, x, 0.1 * x)


def _layernorm(x, eps=1e-5):         # nn.LayerNorm(50), weight=1, bias=0
    mu = jnp.mean(x, axis=-1, keepdims=True)
    var = jnp.mean((x - mu) ** 2, axis=-1, keepdims=True)
    return (x - mu) * lax.rsqrt(var + eps)


def _softmax_last(x):
    m = jnp.max(x, axis=-1, keepdims=True)
    e = jnp.exp(x - m)
    return e / jnp.sum(e, axis=-1, keepdims=True)


def _largest_tile(n, cap):
    """Largest multiple-of-8 divisor of n that is <= cap (or n itself)."""
    if n <= cap:
        return n
    cap8 = cap - (cap % 8)
    for t in range(cap8, 7, -8):
        if n % t == 0:
            return t
    return n


def _sim_tile(n, cap=256):
    """Entity tile for the similarity kernel.

    The similarity output block's last dim is the tile, so it must be a multiple of 128
    (lane-dense, unmasked stores) or the full entity count."""
    if n <= cap:
        return n
    t = (cap // 128) * 128
    while t >= 128:
        if n % t == 0:
            return t
        t -= 128
    return n


# --------------------------------------------------------------------------
# Shared in-kernel helpers (traced into both kernel B and kernel C)
# --------------------------------------------------------------------------
def _branch_projections(text, img, cross, rg1_t, rg2, imgp0, textp0,
                        wip_ref, bip, wtp_ref, btp):
    """Relation-guided attention + LayerNorm + projection for both modalities.

    text  [n, 4, 50], img [n, 24, 50], cross [n, 24, 4]
    rg1_t [4, 24] (= rel_guided_img gate transposed), rg2 [24, 4]
    imgp0/textp0 [n, 50] batch-invariant projection halves (from kernel A2).
    Returns img_proj [n, 50], text_proj [n, 50].
    """
    n, t_tok, a_dim = text.shape
    i_tok = img.shape[1]

    # image branch: img_att_rg[n,j,:] = sum_i rg1[i,j] * cross[n,i,j] * img[n,i,:]
    img_proj = imgp0 + bip
    for j in range(t_tok):                                            # 4 output tokens
        w_j = rg1_t[j:j + 1, :][:, :, None] * cross[:, :, j:j + 1]    # [1,24,1]*[n,24,1]
        v_j = jnp.sum(w_j * img, axis=1)                              # [n, 50]
        img_proj = img_proj + jnp.dot(_layernorm(v_j), wip_ref[j],
                                      preferred_element_type=jnp.float32)

    # text branch: text_att_rg[n,i,:] = sum_j rg2[i,j] * cross[n,i,j] * text[n,j,:]
    t_rg = jnp.zeros((n, i_tok, a_dim), jnp.float32)
    for j in range(t_tok):                                            # 4 text tokens
        wgt = rg2[:, j:j + 1][None, :, :] * cross[:, :, j:j + 1]      # [n, 24, 1]
        t_rg = t_rg + wgt * text[:, j:j + 1, :]                       # [n, 24, 50]
    t_rg_ln = _layernorm(t_rg)
    text_proj = textp0 + btp
    # TODO(synk): collapse into one [n, 24*50] @ [1200, 50] matmul once a safe flat layout exists.
    for i in range(i_tok):                                            # 24 tokens
        text_proj = text_proj + jnp.dot(t_rg_ln[:, i, :], wtp_ref[i],
                                        preferred_element_type=jnp.float32)
    return img_proj, text_proj


def _entity_gate(ent, enth, relh, w3, b3):
    """t_att = t * sigmoid(W3 leaky(W1 [t, rel] + b1)); relh already includes b1."""
    h = _leaky(enth + relh)                                           # [n, 100]
    gate = jax.nn.sigmoid(jnp.dot(h, w3, preferred_element_type=jnp.float32) + b3)
    return ent * gate


def _cosine_row(x, pos):
    """x [n, D], pos [1, D] -> lane-dense [1, n] cosine similarities."""
    nt = (((1,), (1,)), ((), ()))                  # contract dim-1 of both (A @ B^T)
    dots = lax.dot_general(pos, x, nt, preferred_element_type=jnp.float32)       # [1, n]
    ones = jnp.ones((1, x.shape[1]), jnp.float32)
    sq = lax.dot_general(ones, x * x, nt, preferred_element_type=jnp.float32)    # [1, n]
    pn = jnp.sqrt(jnp.sum(pos * pos, axis=1, keepdims=True))                     # [1, 1]
    return dots / (jnp.sqrt(sq) * pn + 1e-10)


# --------------------------------------------------------------------------
# Kernel A1: modality encoder  out = LeakyReLU(x @ W + b), tiled over rows
# --------------------------------------------------------------------------
def encoder_kernel(x_ref, w_ref, b_ref, o_ref):
    o_ref[...] = _leaky(
        jnp.dot(x_ref[...], w_ref[...], preferred_element_type=jnp.float32)
        + b_ref[...])


# --------------------------------------------------------------------------
# Kernel A2: per-entity batch-invariant precompute (runs once, not per batch)
#   cross[n,i,j]          = sum_a img[n,i,a] * text[n,j,a]
#   imgp0  = sum_j LN(img_att)[:,j,:]  @ Wip[j]     (batch-invariant projection half)
#   textp0 = sum_i LN(text_att)[:,i,:] @ Wtp[i]
#   enth   = entity_embedding @ W1[:, :ent_dim].T
# --------------------------------------------------------------------------
def precompute_kernel(text_ref, img_ref, ent_ref, wip_ref, wtp_ref, w1e_ref,
                      cross_ref, imgp0_ref, textp0_ref, enth_ref):
    text = text_ref[...]                            # [tn, 4, 50]
    img = img_ref[...]                              # [tn, 24, 50]
    tn, t_tok, a_dim = text.shape
    i_tok = img.shape[1]

    cross = jnp.einsum('nia,nja->nij', img, text,
                       preferred_element_type=jnp.float32)            # [tn,24,4]
    cross_ref[...] = cross
    cross_t = jnp.einsum('nja,nia->nji', text, img,
                         preferred_element_type=jnp.float32)          # [tn,4,24]

    img_att = jnp.einsum('nji,nia->nja', _softmax_last(cross_t), img,
                         preferred_element_type=jnp.float32)          # [tn,4,50]
    text_att = jnp.einsum('nij,nja->nia', _softmax_last(cross), text,
                          preferred_element_type=jnp.float32)         # [tn,24,50]
    img_att_ln = _layernorm(img_att)
    text_att_ln = _layernorm(text_att)

    imgp0 = jnp.zeros((tn, a_dim), jnp.float32)
    for j in range(t_tok):                                            # 4 tokens
        imgp0 = imgp0 + jnp.dot(img_att_ln[:, j, :], wip_ref[j],
                                preferred_element_type=jnp.float32)
    imgp0_ref[...] = imgp0

    textp0 = jnp.zeros((tn, a_dim), jnp.float32)
    for i in range(i_tok):                                            # 24 tokens
        textp0 = textp0 + jnp.dot(text_att_ln[:, i, :], wtp_ref[i],
                                  preferred_element_type=jnp.float32)
    textp0_ref[...] = textp0

    enth_ref[...] = jnp.dot(ent_ref[...], w1e_ref[...],
                            preferred_element_type=jnp.float32)       # [tn,100]


# --------------------------------------------------------------------------
# Kernel B: per-batch relation gates + POSITIVE entity projections.
#   The positive entity's rows are gathered by the BlockSpec index_maps via the
#   scalar-prefetched pos_idx, so kernel C never needs the full entity set at once.
# --------------------------------------------------------------------------
def pos_kernel(pos_idx_ref,                         # scalar prefetch (SMEM) [B]  (used in index_maps)
               rel_ref, text_ref, img_ref, cross_ref, imgp0_ref, textp0_ref,
               ent_ref, enth_ref,
               wr1_ref, br1_ref, wr2_ref, br2_ref,
               wip_ref, bip_ref, wtp_ref, btp_ref,
               w1r_ref, b1_ref, w3_ref, b3_ref,
               rg1t_o, rg2_o, relh_o, pos_img_o, pos_text_o, pos_t_o):
    del pos_idx_ref                                  # consumed by index_maps only
    rel = rel_ref[0]                                 # [1, Dr]

    # relation-guided gates (tiny; lane-reduce over Dr)
    rg1_t = jax.nn.sigmoid(jnp.sum(wr1_ref[...] * rel[:, None, :], axis=-1)
                           + br1_ref[...])                            # [4, 24] = rel_guided_img^T
    rg2 = jax.nn.sigmoid(jnp.sum(wr2_ref[...] * rel[:, None, :], axis=-1)
                         + br2_ref[...])                              # [24, 4]
    relh = jnp.dot(rel, w1r_ref[...],
                   preferred_element_type=jnp.float32) + b1_ref[...]  # [1, 100] (incl. b1)
    rg1t_o[0] = rg1_t
    rg2_o[0] = rg2
    relh_o[0] = relh

    # positive entity (single row) through the exact same branch pipeline
    img_proj, text_proj = _branch_projections(
        text_ref[...], img_ref[...], cross_ref[...], rg1_t, rg2,
        imgp0_ref[0], textp0_ref[0], wip_ref, bip_ref[...], wtp_ref, btp_ref[...])
    pos_img_o[0] = img_proj                                            # [1, 50]
    pos_text_o[0] = text_proj                                          # [1, 50]
    pos_t_o[0] = _entity_gate(ent_ref[0], enth_ref[0], relh,
                              w3_ref[...], b3_ref[...])                # [1, De]


# --------------------------------------------------------------------------
# Kernel C: (entity-tile, batch) grid -- relation-guided attention + gate + cosine sims.
#   Entity axis is the OUTER grid dim so the big per-entity tiles stay resident in VMEM
#   across the inner batch loop (only the tiny per-batch blocks are re-fetched).
# --------------------------------------------------------------------------
def sim_kernel(text_ref, img_ref, cross_ref, imgp0_ref, textp0_ref,
               ent_ref, enth_ref,
               rg1t_ref, rg2_ref, relh_ref, pos_img_ref, pos_text_ref, pos_t_ref,
               wip_ref, bip_ref, wtp_ref, btp_ref, w3_ref, b3_ref,
               sim_img_ref, sim_text_ref, sim_t_ref):
    img_proj, text_proj = _branch_projections(
        text_ref[...], img_ref[...], cross_ref[...], rg1t_ref[0], rg2_ref[0],
        imgp0_ref[...], textp0_ref[...], wip_ref, bip_ref[...], wtp_ref, btp_ref[...])
    t_att = _entity_gate(ent_ref[...], enth_ref[...], relh_ref[0],
                         w3_ref[...], b3_ref[...])

    sim_img_ref[0] = _cosine_row(img_proj, pos_img_ref[0])             # [1, tile]
    sim_text_ref[0] = _cosine_row(text_proj, pos_text_ref[0])
    sim_t_ref[0] = _cosine_row(t_att, pos_t_ref[0])


# --------------------------------------------------------------------------
# Kernel D: per-batch temperature softmaxes over the full entity axis.
# --------------------------------------------------------------------------
def softmax_sum_kernel(sim_t_ref, sim_img_ref, sim_text_ref, out_ref, *, temperature):
    inv_t = 1.0 / temperature
    out_ref[...] = (_softmax_last(sim_t_ref[...] * inv_t)
                    + _softmax_last(sim_img_ref[...] * inv_t)
                    + _softmax_last(sim_text_ref[...] * inv_t))


# --------------------------------------------------------------------------
# Wrapper (glue: gathers, weight re-packing, pallas_call plumbing)
# --------------------------------------------------------------------------
def kca_forward(params, ent_text_emb, ent_img_emb, entity_embedding,
                relation_embedding, positive_sample, mode, temperature):
    f32 = jnp.float32
    h_or_t = 0 if mode == 'head-batch' else 2
    n_ent, t_tok, text_dim = ent_text_emb.shape
    _, i_tok, img_dim = ent_img_emb.shape
    ent_dim = entity_embedding.shape[1]
    rel_dim = relation_embedding.shape[1]
    a_dim = params['W_text'].shape[0]
    h_dim = params['W1'].shape[0]
    bsz = positive_sample.shape[0]

    # ----- Kernel A1: modality encoders (row-tiled, wide-K matmuls) -----
    def run_encoder(raw_flat, w, b):
        rows, in_dim = raw_flat.shape
        tile_r = _largest_tile(rows, 1024)
        return pl.pallas_call(
            encoder_kernel,
            grid=(rows // tile_r,),
            in_specs=[pl.BlockSpec((tile_r, in_dim), lambda r: (r, 0)),
                      pl.BlockSpec((in_dim, a_dim), lambda r: (0, 0)),
                      pl.BlockSpec((1, a_dim), lambda r: (0, 0))],
            out_specs=pl.BlockSpec((tile_r, a_dim), lambda r: (r, 0)),
            out_shape=jax.ShapeDtypeStruct((rows, a_dim), f32),
            compiler_params=pltpu.CompilerParams(dimension_semantics=("parallel",)),
        )(raw_flat, w, b)

    text_emb = run_encoder(ent_text_emb.reshape(n_ent * t_tok, text_dim),
                           params['W_text'].T, params['b_text'][None, :]
                           ).reshape(n_ent, t_tok, a_dim)
    img_emb = run_encoder(ent_img_emb.reshape(n_ent * i_tok, img_dim),
                          params['W_img'].T, params['b_img'][None, :]
                          ).reshape(n_ent, i_tok, a_dim)

    # ----- glue: weight re-packing -----
    wip = params['W_ip'].reshape(a_dim, t_tok, a_dim).transpose(1, 2, 0)      # [4,50,50]
    wtp = params['W_tp'].reshape(a_dim, i_tok, a_dim).transpose(1, 2, 0)      # [24,50,50]
    w1e = params['W1'][:, :ent_dim].T                                         # [De,100]
    w1r = params['W1'][:, ent_dim:].T                                         # [Dr,100]
    w3 = params['W3'].T                                                       # [100,De]
    wr1 = params['W_rel1'].reshape(i_tok, t_tok, rel_dim).transpose(1, 0, 2)  # [4,24,Dr]
    br1 = params['b_rel1'].reshape(i_tok, t_tok).T                            # [4,24]
    wr2 = params['W_rel2'].reshape(i_tok, t_tok, rel_dim)                     # [24,4,Dr]
    br2 = params['b_rel2'].reshape(i_tok, t_tok)                              # [24,4]
    b_ip = params['b_ip'][None, :]
    b_tp = params['b_tp'][None, :]
    b1 = params['b1'][None, :]
    b3 = params['b3'][None, :]

    ent_f32 = entity_embedding.astype(f32)

    # ----- Kernel A2: per-entity batch-invariant precompute -----
    tile_n = _largest_tile(n_ent, 256)
    cross, imgp0, textp0, enth = pl.pallas_call(
        precompute_kernel,
        grid=(n_ent // tile_n,),
        in_specs=[
            pl.BlockSpec((tile_n, t_tok, a_dim), lambda e: (e, 0, 0)),
            pl.BlockSpec((tile_n, i_tok, a_dim), lambda e: (e, 0, 0)),
            pl.BlockSpec((tile_n, ent_dim), lambda e: (e, 0)),
            pl.BlockSpec((t_tok, a_dim, a_dim), lambda e: (0, 0, 0)),
            pl.BlockSpec((i_tok, a_dim, a_dim), lambda e: (0, 0, 0)),
            pl.BlockSpec((ent_dim, h_dim), lambda e: (0, 0)),
        ],
        out_specs=[
            pl.BlockSpec((tile_n, i_tok, t_tok), lambda e: (e, 0, 0)),
            pl.BlockSpec((tile_n, a_dim), lambda e: (e, 0)),
            pl.BlockSpec((tile_n, a_dim), lambda e: (e, 0)),
            pl.BlockSpec((tile_n, h_dim), lambda e: (e, 0)),
        ],
        out_shape=[
            jax.ShapeDtypeStruct((n_ent, i_tok, t_tok), f32),
            jax.ShapeDtypeStruct((n_ent, a_dim), f32),
            jax.ShapeDtypeStruct((n_ent, a_dim), f32),
            jax.ShapeDtypeStruct((n_ent, h_dim), f32),
        ],
        compiler_params=pltpu.CompilerParams(dimension_semantics=("parallel",)),
    )(text_emb, img_emb, ent_f32, wip, wtp, w1e)

    # ----- Kernel B: relation gates + positive-entity projections (scalar-prefetch gather) -----
    rel_emb = relation_embedding[positive_sample[:, 1]][:, None, :].astype(f32)  # [B,1,Dr]
    pos_idx = positive_sample[:, h_or_t].astype(jnp.int32)                       # [B]

    # 3-D views so single-row blocks keep their last two dims equal to the full dims.
    imgp0_3 = imgp0.reshape(n_ent, 1, a_dim)
    textp0_3 = textp0.reshape(n_ent, 1, a_dim)
    ent_3 = ent_f32.reshape(n_ent, 1, ent_dim)
    enth_3 = enth.reshape(n_ent, 1, h_dim)

    pos_grid = pltpu.PrefetchScalarGridSpec(
        num_scalar_prefetch=1,
        grid=(bsz,),
        in_specs=[
            pl.BlockSpec((1, 1, rel_dim), lambda b, p: (b, 0, 0)),       # rel
            pl.BlockSpec((1, t_tok, a_dim), lambda b, p: (p[b], 0, 0)),  # text[pos]
            pl.BlockSpec((1, i_tok, a_dim), lambda b, p: (p[b], 0, 0)),  # img[pos]
            pl.BlockSpec((1, i_tok, t_tok), lambda b, p: (p[b], 0, 0)),  # cross[pos]
            pl.BlockSpec((1, 1, a_dim), lambda b, p: (p[b], 0, 0)),      # imgp0[pos]
            pl.BlockSpec((1, 1, a_dim), lambda b, p: (p[b], 0, 0)),      # textp0[pos]
            pl.BlockSpec((1, 1, ent_dim), lambda b, p: (p[b], 0, 0)),    # ent[pos]
            pl.BlockSpec((1, 1, h_dim), lambda b, p: (p[b], 0, 0)),      # enth[pos]
            pl.BlockSpec((t_tok, i_tok, rel_dim), lambda b, p: (0, 0, 0)),  # wr1
            pl.BlockSpec((t_tok, i_tok), lambda b, p: (0, 0)),              # br1
            pl.BlockSpec((i_tok, t_tok, rel_dim), lambda b, p: (0, 0, 0)),  # wr2
            pl.BlockSpec((i_tok, t_tok), lambda b, p: (0, 0)),              # br2
            pl.BlockSpec((t_tok, a_dim, a_dim), lambda b, p: (0, 0, 0)),    # wip
            pl.BlockSpec((1, a_dim), lambda b, p: (0, 0)),                  # b_ip
            pl.BlockSpec((i_tok, a_dim, a_dim), lambda b, p: (0, 0, 0)),    # wtp
            pl.BlockSpec((1, a_dim), lambda b, p: (0, 0)),                  # b_tp
            pl.BlockSpec((rel_dim, h_dim), lambda b, p: (0, 0)),            # w1r
            pl.BlockSpec((1, h_dim), lambda b, p: (0, 0)),                  # b1
            pl.BlockSpec((h_dim, ent_dim), lambda b, p: (0, 0)),            # w3
            pl.BlockSpec((1, ent_dim), lambda b, p: (0, 0)),                # b3
        ],
        out_specs=[
            pl.BlockSpec((1, t_tok, i_tok), lambda b, p: (b, 0, 0)),     # rg1^T
            pl.BlockSpec((1, i_tok, t_tok), lambda b, p: (b, 0, 0)),     # rg2
            pl.BlockSpec((1, 1, h_dim), lambda b, p: (b, 0, 0)),         # relh (incl. b1)
            pl.BlockSpec((1, 1, a_dim), lambda b, p: (b, 0, 0)),         # pos_img
            pl.BlockSpec((1, 1, a_dim), lambda b, p: (b, 0, 0)),         # pos_text
            pl.BlockSpec((1, 1, ent_dim), lambda b, p: (b, 0, 0)),       # pos_t
        ],
    )
    rg1t, rg2, relh, pos_img, pos_text, pos_t = pl.pallas_call(
        pos_kernel,
        grid_spec=pos_grid,
        out_shape=[
            jax.ShapeDtypeStruct((bsz, t_tok, i_tok), f32),
            jax.ShapeDtypeStruct((bsz, i_tok, t_tok), f32),
            jax.ShapeDtypeStruct((bsz, 1, h_dim), f32),
            jax.ShapeDtypeStruct((bsz, 1, a_dim), f32),
            jax.ShapeDtypeStruct((bsz, 1, a_dim), f32),
            jax.ShapeDtypeStruct((bsz, 1, ent_dim), f32),
        ],
        compiler_params=pltpu.CompilerParams(dimension_semantics=("arbitrary",)),
    )(pos_idx, rel_emb, text_emb, img_emb, cross, imgp0_3, textp0_3, ent_3, enth_3,
      wr1, br1, wr2, br2, wip, b_ip, wtp, b_tp, w1r, b1, w3, b3)

    # ----- Kernel C: entity-tiled similarities (entity outer so big tiles stay resident) -----
    tile_e = _sim_tile(n_ent, 256)
    n_tiles_e = n_ent // tile_e

    sim_in_specs = [
        pl.BlockSpec((tile_e, t_tok, a_dim), lambda e, b: (e, 0, 0)),   # text
        pl.BlockSpec((tile_e, i_tok, a_dim), lambda e, b: (e, 0, 0)),   # img
        pl.BlockSpec((tile_e, i_tok, t_tok), lambda e, b: (e, 0, 0)),   # cross
        pl.BlockSpec((tile_e, a_dim), lambda e, b: (e, 0)),             # imgp0
        pl.BlockSpec((tile_e, a_dim), lambda e, b: (e, 0)),             # textp0
        pl.BlockSpec((tile_e, ent_dim), lambda e, b: (e, 0)),           # ent
        pl.BlockSpec((tile_e, h_dim), lambda e, b: (e, 0)),             # enth
        pl.BlockSpec((1, t_tok, i_tok), lambda e, b: (b, 0, 0)),        # rg1^T
        pl.BlockSpec((1, i_tok, t_tok), lambda e, b: (b, 0, 0)),        # rg2
        pl.BlockSpec((1, 1, h_dim), lambda e, b: (b, 0, 0)),            # relh
        pl.BlockSpec((1, 1, a_dim), lambda e, b: (b, 0, 0)),            # pos_img
        pl.BlockSpec((1, 1, a_dim), lambda e, b: (b, 0, 0)),            # pos_text
        pl.BlockSpec((1, 1, ent_dim), lambda e, b: (b, 0, 0)),          # pos_t
        pl.BlockSpec((t_tok, a_dim, a_dim), lambda e, b: (0, 0, 0)),    # wip
        pl.BlockSpec((1, a_dim), lambda e, b: (0, 0)),                  # b_ip
        pl.BlockSpec((i_tok, a_dim, a_dim), lambda e, b: (0, 0, 0)),    # wtp
        pl.BlockSpec((1, a_dim), lambda e, b: (0, 0)),                  # b_tp
        pl.BlockSpec((h_dim, ent_dim), lambda e, b: (0, 0)),            # w3
        pl.BlockSpec((1, ent_dim), lambda e, b: (0, 0)),                # b3
    ]
    sim_out_spec = pl.BlockSpec((1, 1, tile_e), lambda e, b: (b, 0, e))
    sim_img3, sim_text3, sim_t3 = pl.pallas_call(
        sim_kernel,
        grid=(n_tiles_e, bsz),
        in_specs=sim_in_specs,
        out_specs=[sim_out_spec] * 3,
        out_shape=[jax.ShapeDtypeStruct((bsz, 1, n_ent), f32)] * 3,
        compiler_params=pltpu.CompilerParams(
            dimension_semantics=("parallel", "arbitrary")),
    )(text_emb, img_emb, cross, imgp0, textp0, ent_f32, enth,
      rg1t, rg2, relh, pos_img, pos_text, pos_t,
      wip, b_ip, wtp, b_tp, w3, b3)

    # ----- Kernel D: temperature softmaxes over the full entity axis, per batch row -----
    kernel_d = functools.partial(softmax_sum_kernel, temperature=float(temperature))
    sm_sum3 = pl.pallas_call(
        kernel_d,
        grid=(bsz,),
        in_specs=[pl.BlockSpec((1, 1, n_ent), lambda b: (b, 0, 0))] * 3,
        out_specs=pl.BlockSpec((1, 1, n_ent), lambda b: (b, 0, 0)),
        out_shape=jax.ShapeDtypeStruct((bsz, 1, n_ent), f32),
        compiler_params=pltpu.CompilerParams(dimension_semantics=("parallel",)),
    )(sim_t3, sim_img3, sim_text3)

    return (sm_sum3[:, 0, :], sim_img3[:, 0, :], sim_text3[:, 0, :], sim_t3[:, 0, :])


# --------------------------------------------------------------------------
# Deterministic parameter init (xavier_normal_ on weights, small biases)
# --------------------------------------------------------------------------
def init_params(key, ent_dim, rel_dim, a_dim=50, h_dim=100, t_tok=4, i_tok=24,
                text_dim=384, img_dim=383):
    def xavier(k, shape):
        fan_out, fan_in = shape
        std = math.sqrt(2.0 / (fan_in + fan_out))
        return std * jax.random.normal(k, shape, jnp.float32)

    ks = jax.random.split(key, 16)
    p = {}
    p['W_text'] = xavier(ks[0], (a_dim, text_dim)); p['b_text'] = 0.01 * jax.random.normal(ks[1], (a_dim,))
    p['W_img'] = xavier(ks[2], (a_dim, img_dim));   p['b_img'] = 0.01 * jax.random.normal(ks[3], (a_dim,))
    p['W_tp'] = xavier(ks[4], (a_dim, a_dim * i_tok)); p['b_tp'] = 0.01 * jax.random.normal(ks[5], (a_dim,))
    p['W_ip'] = xavier(ks[6], (a_dim, a_dim * t_tok)); p['b_ip'] = 0.01 * jax.random.normal(ks[7], (a_dim,))
    p['W_rel1'] = xavier(ks[8], (i_tok * t_tok, rel_dim)); p['b_rel1'] = 0.01 * jax.random.normal(ks[9], (i_tok * t_tok,))
    p['W_rel2'] = xavier(ks[10], (i_tok * t_tok, rel_dim)); p['b_rel2'] = 0.01 * jax.random.normal(ks[11], (i_tok * t_tok,))
    p['W1'] = xavier(ks[12], (h_dim, ent_dim + rel_dim)); p['b1'] = 0.01 * jax.random.normal(ks[13], (h_dim,))
    p['W3'] = xavier(ks[14], (ent_dim, h_dim)); p['b3'] = 0.01 * jax.random.normal(ks[15], (ent_dim,))
    return p


# --------------------------------------------------------------------------
# Pure-JAX reference (mirrors the PyTorch forward) for a sanity check
# --------------------------------------------------------------------------
def reference_forward(params, ent_text_emb, ent_img_emb, entity_embedding,
                      relation_embedding, positive_sample, mode, temperature):
    h_or_t = 0 if mode == 'head-batch' else 2
    rel = relation_embedding[positive_sample[:, 1]]
    bsz = rel.shape[0]
    text_emb = _leaky(jnp.einsum('nkd,ad->nka', ent_text_emb, params['W_text']) + params['b_text'])
    img_emb = _leaky(jnp.einsum('nkd,ad->nka', ent_img_emb, params['W_img']) + params['b_img'])
    n_ent = text_emb.shape[0]
    cross = jnp.matmul(img_emb, jnp.transpose(text_emb, (0, 2, 1)))          # [N,24,4]
    img_att = jnp.matmul(jax.nn.softmax(jnp.transpose(cross, (0, 2, 1)), axis=2), img_emb)
    rg1 = jax.nn.sigmoid(rel @ params['W_rel1'].T + params['b_rel1']).reshape(bsz, 24, 4)
    rg1 = rg1[:, None, :, :] * cross[None]
    img_att_rg = jnp.matmul(jnp.transpose(rg1, (0, 1, 3, 2)), img_emb[None])

    def LN(x):
        mu = x.mean(-1, keepdims=True)
        var = ((x - mu) ** 2).mean(-1, keepdims=True)
        return (x - mu) / jnp.sqrt(var + 1e-5)

    img_all = LN(img_att_rg) + LN(img_att)
    text_att = jnp.matmul(jax.nn.softmax(cross, axis=2), text_emb)
    rg2 = jax.nn.sigmoid(rel @ params['W_rel2'].T + params['b_rel2']).reshape(bsz, 24, 4)
    rg2 = rg2[:, None, :, :] * cross[None]
    text_att_rg = jnp.matmul(rg2, text_emb[None])
    text_all = LN(text_att_rg) + LN(text_att)
    img_all_p = img_all.reshape(bsz, n_ent, -1) @ params['W_ip'].T + params['b_ip']
    text_all_p = text_all.reshape(bsz, n_ent, -1) @ params['W_tp'].T + params['b_tp']
    t = jnp.broadcast_to(entity_embedding[None], (bsz,) + entity_embedding.shape)
    rel_b = jnp.broadcast_to(rel[:, None, :], (bsz, n_ent, rel.shape[1]))
    att = jnp.concatenate([t, rel_b], axis=2)
    att = _leaky(att @ params['W1'].T + params['b1'])
    att = jax.nn.sigmoid(att @ params['W3'].T + params['b3'])
    t_att = t * att
    bidx = jnp.arange(bsz)
    pos_idx = positive_sample[:, h_or_t]
    pos_img, pos_text, pos_t = img_all_p[bidx, pos_idx], text_all_p[bidx, pos_idx], t_att[bidx, pos_idx]

    def sim(x, p):
        d = jnp.einsum('bnd,bd->bn', x, p)
        return d / (jnp.linalg.norm(x, axis=2) * jnp.linalg.norm(p, axis=1)[:, None] + 1e-10)

    s_img, s_text, s_t = sim(img_all_p, pos_img), sim(text_all_p, pos_text), sim(t_att, pos_t)
    sm = lambda x: jax.nn.softmax(x / temperature, axis=1)
    return sm(s_t) + sm(s_img) + sm(s_text), s_img, s_text, s_t


if __name__ == "__main__":
    key = jax.random.PRNGKey(0)
    B, N, N_REL = 2, 8, 4
    ENT_DIM = REL_DIM = 32             # args.hidden_dim=32, no double embeddings
    T_TOK, I_TOK, TEXT_DIM, IMG_DIM = 4, 24, 384, 383
    TEMPERATURE = 0.5
    MODE = 'tail-batch'

    k0, k1, k2, k3, k4, k5 = jax.random.split(key, 6)
    params = init_params(k0, ENT_DIM, REL_DIM)
    ent_text_emb = jax.random.normal(k1, (N, T_TOK, TEXT_DIM), jnp.float32)
    ent_img_emb = jax.random.normal(k2, (N, I_TOK, IMG_DIM), jnp.float32)
    entity_embedding = jax.random.normal(k3, (N, ENT_DIM), jnp.float32)
    relation_embedding = jax.random.normal(k4, (N_REL, REL_DIM), jnp.float32)
    heads = jax.random.randint(k5, (B,), 0, N)
    rels = jax.random.randint(jax.random.fold_in(k5, 1), (B,), 0, N_REL)
    tails = jax.random.randint(jax.random.fold_in(k5, 2), (B,), 0, N)
    positive_sample = jnp.stack([heads, rels, tails], axis=1).astype(jnp.int32)

    outs = kca_forward(params, ent_text_emb, ent_img_emb, entity_embedding,
                       relation_embedding, positive_sample, MODE, TEMPERATURE)
    outs = jax.block_until_ready(outs)

    refs = reference_forward(params, ent_text_emb, ent_img_emb, entity_embedding,
                             relation_embedding, positive_sample, MODE, TEMPERATURE)
    names = ["softmax_sum", "simil_img", "simil_text", "simil_t"]
    for got, want, name in zip(outs, refs, names):
        err = float(jnp.max(jnp.abs(got - want)))
        if not (err < 5e-2):
            raise AssertionError(f"{name} mismatch, max abs err {err}")
    print("KERNEL_OK")
</pallas_src>

<mosaic_0001>
module attributes {stable_mosaic.version = 11 : i64} {
  func.func @encoder_kernel(%arg0: i32, %arg1: memref<32x384xf32, #tpu.memory_space<vmem>>, %arg2: memref<384x50xf32, #tpu.memory_space<vmem>>, %arg3: memref<1x50xf32, #tpu.memory_space<vmem>>, %arg4: memref<32x50xf32, #tpu.memory_space<vmem>>) attributes {dimension_semantics = [#tpu.dimension_semantics<parallel>], iteration_bounds = array<i64: 1>, scalar_prefetch = 0 : i64, scratch_operands = 0 : i64, tpu.core_type = #tpu.core_type<tc>, window_params = [{transform_indices = @transform_0, window_bounds = array<i64: 32, 384>}, {pipeline_mode = #tpu.pipeline_mode<synchronous>, transform_indices = @transform_1, window_bounds = array<i64: 384, 50>}, {pipeline_mode = #tpu.pipeline_mode<synchronous>, transform_indices = @transform_2, window_bounds = array<i64: 1, 50>}, {transform_indices = @transform_3, window_bounds = array<i64: 32, 50>}]} {
    %c0 = arith.constant 0 : index
    %c0_0 = arith.constant 0 : index
    %0 = vector.load %arg1[%c0, %c0_0] : memref<32x384xf32, #tpu.memory_space<vmem>>, vector<32x384xf32>
    %c0_1 = arith.constant 0 : index
    %c0_2 = arith.constant 0 : index
    %1 = vector.load %arg2[%c0_1, %c0_2] : memref<384x50xf32, #tpu.memory_space<vmem>>, vector<384x50xf32>
    %cst = arith.constant dense<0.000000e+00> : vector<32x50xf32>
    %2 = tpu.matmul %0, %1, %cst {dimension_numbers = #tpu.dot_dimension_numbers<[1], [0], [0], [1], [0, 0, 1, 1], [], []>} : vector<32x384xf32>, vector<384x50xf32>, vector<32x50xf32> -> vector<32x50xf32>
    %c0_3 = arith.constant 0 : index
    %c0_4 = arith.constant 0 : index
    %3 = vector.load %arg3[%c0_3, %c0_4] : memref<1x50xf32, #tpu.memory_space<vmem>>, vector<1x50xf32>
    %4 = vector.broadcast %3 : vector<1x50xf32> to vector<32x50xf32>
    %5 = arith.addf %2, %4 : vector<32x50xf32>
    %cst_5 = arith.constant 0.000000e+00 : f32
    %6 = vector.broadcast %cst_5 : f32 to vector<32x50xf32>
    %7 = arith.cmpf ogt, %5, %6 : vector<32x50xf32>
    %cst_6 = arith.constant 1.000000e-01 : f32
    %8 = vector.broadcast %cst_6 : f32 to vector<32x50xf32>
    %9 = arith.mulf %8, %5 : vector<32x50xf32>
    %10 = arith.select %7, %5, %9 : vector<32x50xi1>, vector<32x50xf32>
    %c0_7 = arith.constant 0 : index
    %c0_8 = arith.constant 0 : index
    %11 = vector.load %arg4[%c0_7, %c0_8] : memref<32x50xf32, #tpu.memory_space<vmem>>, vector<32x50xf32>
    tpu.vector_store %arg4[%c0_7, %c0_8], %10 {strides = array<i32>} : memref<32x50xf32, #tpu.memory_space<vmem>>, vector<32x50xf32>,
    return
  }
  func.func @transform_0(%arg0: i32) -> (i32, i32) {
    %c0_i32 = arith.constant 0 : i32
    %c0_i32_0 = arith.constant 0 : i32
    return %arg0, %c0_i32 : i32, i32
  }
  func.func @transform_1(%arg0: i32) -> (i32, i32) {
    %c0_i32 = arith.constant 0 : i32
    %c0_i32_0 = arith.constant 0 : i32
    %c0_i32_1 = arith.constant 0 : i32
    return %c0_i32, %c0_i32_0 : i32, i32
  }
  func.func @transform_2(%arg0: i32) -> (i32, i32) {
    %c0_i32 = arith.constant 0 : i32
    %c0_i32_0 = arith.constant 0 : i32
    %c0_i32_1 = arith.constant 0 : i32
    return %c0_i32, %c0_i32_0 : i32, i32
  }
  func.func @transform_3(%arg0: i32) -> (i32, i32) {
    %c0_i32 = arith.constant 0 : i32
    %c0_i32_0 = arith.constant 0 : i32
    return %arg0, %c0_i32 : i32, i32
  }
}

</mosaic_0001>

<bundles_post_ra>
// kernel: tpu_custom_call.1
= control target key start
LH: loop header
LB: loop body
LE: loop exit
PB: predicated region body
PF: predicated region fallthrough
CT: control target
= control target key end

     0   :  { %s626_s0 = inlined_call_operand.vmem [shape: f32[32,384], index: 0, kind: input, shape index: {}]   ;;  %s627_s1 = inlined_call_operand.vmem [shape: f32[384,50], index: 1, kind: input, shape index: {}]   ;;  %s628_s2 = inlined_call_operand.vmem [shape: f32[1,50], index: 2, kind: input, shape index: {}]   ;;  %s629_s3 = inlined_call_operand.hbm [shape: f32[32,50], index: 3, kind: output, shape index: {}]  }
   0x1   :  { %v58_v0 = vld [vmem:[%s627_s1 + $0xf8] sm:$0xff]  ;;  %v57_v2 = vld [vmem:[%s627_s1 + $0xf0] sm:$0xff]  ;;  %v56_v5 = vld [vmem:[%s627_s1 + $0xe8] sm:$0xff] }
   0x2   :  { %v42_v1 = vld [vmem:[%s627_s1 + $0x78] sm:$0xff]  ;;  %286 = vmatprep.subr.mxu0 %v58_v0  ;;  %v41_v3 = vld [vmem:[%s627_s1 + $0x70] sm:$0xff]  ;;  %v40_v7 = vld [vmem:[%s627_s1 + $0x68] sm:$0xff] }
   0x3   :  { %v74_v4 = vld [vmem:[%s627_s1 + $0x178] sm:$0xff]  ;;  %287 = vmatpush3.msra.mxu0 %v42_v1  ;;  %v73_v6 = vld [vmem:[%s627_s1 + $0x170] sm:$0xff]  ;;  %v72_v8 = vld [vmem:[%s627_s1 + $0x168] sm:$0xff] }
   0x4   :  { %350 = vmatprep.subr.mxu1 %v74_v4  ;;  %288 = vmatprep.subr.mxu0 %v57_v2  ;;  %v55_v9 = vld [vmem:[%s627_s1 + $0xe0] sm:$0xff]  ;;  %v54_v12 = vld [vmem:[%s627_s1 + $0xd8] sm:$0xff]  ;;  %v53_v15 = vld [vmem:[%s627_s1 + $0xd0] sm:$0xff] }
   0x5   :  { %351 = vmatpush3.msra.mxu1 %v74_v4  ;;  %289 = vmatpush3.msra.mxu0 %v41_v3  ;;  %v39_v10 = vld [vmem:[%s627_s1 + $0x60] sm:$0xff]  ;;  %v38_v13 = vld [vmem:[%s627_s1 + $0x58] sm:$0xff]  ;;  %v37_v16 = vld [vmem:[%s627_s1 + $0x50] sm:$0xff] }
   0x6   :  { %352 = vmatprep.subr.mxu1 %v73_v6  ;;  %290 = vmatprep.subr.mxu0 %v56_v5  ;;  %v71_v11 = vld [vmem:[%s627_s1 + $0x160] sm:$0xff]  ;;  %v70_v14 = vld [vmem:[%s627_s1 + $0x158] sm:$0xff]  ;;  %v69_v17 = vld [vmem:[%s627_s1 + $0x150] sm:$0xff] }
   0x7   :  { %353 = vmatpush3.msra.mxu1 %v73_v6  ;;  %291 = vmatpush3.msra.mxu0 %v40_v7  ;;  %v52_v18 = vld [vmem:[%s627_s1 + $0xc8] sm:$0xff]  ;;  %v51_v21 = vld [vmem:[%s627_s1 + $0xc0] sm:$0xff]  ;;  %v50_v24 = vld [vmem:[%s627_s1 + $0xb8] sm:$0xff] }
   0x8   :  { %354 = vmatprep.subr.mxu1 %v72_v8  ;;  %292 = vmatprep.subr.mxu0 %v55_v9  ;;  %v36_v19 = vld [vmem:[%s627_s1 + $0x48] sm:$0xff]  ;;  %v35_v22 = vld [vmem:[%s627_s1 + $0x40] sm:$0xff]  ;;  %v34_v25 = vld [vmem:[%s627_s1 + $0x38] sm:$0xff] }
   0x9   :  { %355 = vmatpush3.msra.mxu1 %v72_v8  ;;  %293 = vmatpush3.msra.mxu0 %v39_v10  ;;  %v68_v20 = vld [vmem:[%s627_s1 + $0x148] sm:$0xff]  ;;  %v67_v23 = vld [vmem:[%s627_s1 + $0x140] sm:$0xff]  ;;  %v66_v26 = vld [vmem:[%s627_s1 + $0x138] sm:$0xff] }
   0xa   :  { %356 = vmatprep.subr.mxu1 %v71_v11  ;;  %294 = vmatprep.subr.mxu0 %v54_v12  ;;  %v49_v27 = vld [vmem:[%s627_s1 + $0xb0] sm:$0xff]  ;;  %v48_v30 = vld [vmem:[%s627_s1 + $0xa8] sm:$0xff]  ;;  %v47_v33 = vld [vmem:[%s627_s1 + $0xa0] sm:$0xff] }
   0xb   :  { %357 = vmatpush3.msra.mxu1 %v71_v11  ;;  %295 = vmatpush3.msra.mxu0 %v38_v13  ;;  %v33_v28 = vld [vmem:[%s627_s1 + $0x30] sm:$0xff]  ;;  %v32_v31 = vld [vmem:[%s627_s1 + $0x28] sm:$0xff] }
   0xc   :  { %358 = vmatprep.subr.mxu1 %v70_v14  ;;  %296 = vmatprep.subr.mxu0 %v53_v15  ;;  %v65_v29 = vld [vmem:[%s627_s1 + $0x130] sm:$0xff]  ;;  %v64_v32 = vld [vmem:[%s627_s1 + $0x128] sm:$0xff] }
   0xd   :  { %359 = vmatpush3.msra.mxu1 %v70_v14  ;;  %297 = vmatpush3.msra.mxu0 %v37_v16 }
   0xe   :  { %360 = vmatprep.subr.mxu1 %v69_v17  ;;  %298 = vmatprep.subr.mxu0 %v52_v18 }
   0xf   :  { %361 = vmatpush3.msra.mxu1 %v69_v17  ;;  %299 = vmatpush3.msra.mxu0 %v36_v19 }
  0x10   :  { %362 = vmatprep.subr.mxu1 %v68_v20  ;;  %300 = vmatprep.subr.mxu0 %v51_v21 }
  0x11   :  { %363 = vmatpush3.msra.mxu1 %v68_v20  ;;  %301 = vmatpush3.msra.mxu0 %v35_v22 }
  0x12   :  { %364 = vmatprep.subr.mxu1 %v67_v23  ;;  %302 = vmatprep.subr.mxu0 %v50_v24 }
  0x13   :  { %365 = vmatpush3.msra.mxu1 %v67_v23  ;;  %303 = vmatpush3.msra.mxu0 %v34_v25 }
  0x14   :  { %366 = vmatprep.subr.mxu1 %v66_v26  ;;  %304 = vmatprep.subr.mxu0 %v49_v27 }
  0x15   :  { %367 = vmatpush3.msra.mxu1 %v66_v26  ;;  %305 = vmatpush3.msra.mxu0 %v33_v28 }
  0x16   :  { %368 = vmatprep.subr.mxu1 %v65_v29 }
  0x17   :  { %8 = vsyncpa [#allocation3], 0  ;;  %306 = vmatprep.subr.mxu0 %v48_v30  ;;  %v31_v34 = vld [vmem:[%s627_s1 + $0x20] sm:$0xff]  ;;  %369 = vmatpush3.msra.mxu1 %v65_v29  ;;  %v46_v36 = vld [vmem:[%s627_s1 + $0x98] sm:$0xff]  ;;  %vm264_vm0 = vcmask 408576  }
  0x18   :  { %v63_v35 = vld [vmem:[%s627_s1 + $0x120] sm:$0xff]  ;;  %307 = vmatpush3.msra.mxu0 %v32_v31  ;;  %370 = vmatprep.subr.mxu1 %v64_v32  ;;  %v30_v37 = vld [vmem:[%s627_s1 + $0x18] sm:$0xff]  ;;  %v45_v39 = vld [vmem:[%s627_s1 + $0x90] sm:$0xff] }
  0x19   :  { %308 = vmatprep.subr.mxu0 %v47_v33  ;;  %371 = vmatpush3.msra.mxu1 %v64_v32  ;;  %v62_v38 = vld [vmem:[%s627_s1 + $0x118] sm:$0xff]  ;;  %v29_v40 = vld [vmem:[%s627_s1 + $0x10] sm:$0xff]  ;;  %v44_v42 = vld [vmem:[%s627_s1 + $0x88] sm:$0xff] }
  0x1a   :  { %309 = vmatpush3.msra.mxu0 %v31_v34  ;;  %372 = vmatprep.subr.mxu1 %v63_v35  ;;  %v61_v41 = vld [vmem:[%s627_s1 + $0x110] sm:$0xff]  ;;  %v16_v43 = vld [vmem:[%s626_s0 + $0x8] sm:$0xff]  ;;  %v43_v45 = vld [vmem:[%s627_s1 + $0x80] sm:$0xff] }
  0x1b   :  { %310 = vmatprep.subr.mxu0 %v46_v36  ;;  %373 = vmatpush3.msra.mxu1 %v63_v35  ;;  %v28_v44 = vld [vmem:[%s627_s1 + $0x8] sm:$0xff]  ;;  %v27_v47 = vld [vmem:[%s627_s1] sm:$0xff]  ;;  %v17_v51 = vld [vmem:[%s626_s0 + $0x10] sm:$0xff] }
  0x1c   :  { %311 = vmatpush3.msra.mxu0 %v30_v37  ;;  %374 = vmatprep.subr.mxu1 %v62_v38  ;;  %v60_v46 = vld [vmem:[%s627_s1 + $0x108] sm:$0xff]  ;;  %v15_v48 = vld [vmem:[%s626_s0] sm:$0xff]  ;;  %v18_v53 = vld [vmem:[%s626_s0 + $0x18] sm:$0xff] }
  0x1d   :  { %312 = vmatprep.subr.mxu0 %v45_v39  ;;  %375 = vmatpush3.msra.mxu1 %v62_v38  ;;  %v59_v49 = vld [vmem:[%s627_s1 + $0x100] sm:$0xff]  ;;  %v20_v52 = vld [vmem:[%s626_s0 + $0x28] sm:$0xff]  ;;  %v22_v55 = vld [vmem:[%s626_s0 + $0x38] sm:$0xff] }
  0x1e   :  { %313 = vmatpush3.msra.mxu0 %v29_v40  ;;  %376 = vmatprep.subr.mxu1 %v61_v41  ;;  %v19_v50 = vld [vmem:[%s626_s0 + $0x20] sm:$0xff]  ;;  %v26_v56 = vld [vmem:[%s626_s0 + $0x58] sm:$0xff]  ;;  %v21_v57 = vld [vmem:[%s626_s0 + $0x30] sm:$0xff] }
  0x1f   :  { %314 = vmatprep.subr.mxu0 %v44_v42  ;;  %146 = vmatprep.mubr.f32.mxu0 %v16_v43  ;;  %v23_v54 = vld [vmem:[%s626_s0 + $0x40] sm:$0xff]  ;;  %v25_v58 = vld [vmem:[%s626_s0 + $0x50] sm:$0xff]  ;;  %v24_v59 = vld [vmem:[%s626_s0 + $0x48] sm:$0xff]  ;;  %s413_s0 = smov [#allocation2]  }
  0x20   :  { %315 = vmatpush3.msra.mxu0 %v28_v44  ;;  %377 = vmatpush3.msra.mxu1 %v61_v41  ;;  %v285_v62 = vld [vmem:[%s628_s2] ss:$0 sm:$0xff]  ;;  %s274_s2 = sshll.u32 %s413_s0, 4  ;;  %s275_s2 = int_to_ptr.vmem [resolvable:$true] %s274_s2 }
  0x21   :  { %316 = vmatprep.subr.mxu0 %v43_v45  ;;  %378 = vmatprep.subr.mxu1 %v60_v46  ;;  %s391_s25 = scalar_lea.vmem %s275_s2, 512  ;;  %p396_p1 = scmp.lt.s32.totalorder %s275_s2, %s275_s2 }
  0x22   :  { %317 = vmatpush3.msra.mxu0 %v27_v47  ;;  %379 = vmatpush3.msra.mxu1 %v60_v46  ;;  %p392_p0 = scmp.ne.s32.totalorder %s275_s2, %s391_s25  ;;  %p397_p2 = scmp.lt.s32.totalorder %s391_s25, %s391_s25 }
  0x23   :  { %147 = vmatmul.mubr.f32.vlgmr.msra.gmra.mxu0 %v15_v48  ;;  %380 = vmatprep.subr.mxu1 %v59_v49 }
  0x24   :  { %151 = vmatprep.mubr.f32.mxu0 %v19_v50  ;;  %381 = vmatpush3.msra.mxu1 %v59_v49  ;;  %p398_p3 = por %p397_p2, %p396_p1 }
  0x25   :  { %382 = vmatprep.mubr.f32.mxu1 %v17_v51 }
  0x26   :  { %383 = vmatmul.mubr.f32.vlgmr.msra.gmra.mxu1 %v20_v52  ;;  %p399_p4 = pnand %p398_p3, %p392_p0 }
  0x27   :  { %152 = vmatmul.mubr.f32.gmra.mxu0 %v18_v53  ;;  %385 = vmatprep.mubr.f32.mxu1 %v23_v54 }
  0x28   :  { %156 = vmatprep.mubr.f32.mxu0 %v22_v55 }
  0x2a   :  { %386 = vmatmul.mubr.f32.gmra.mxu1 %v26_v56 }
  0x2b   :  { %157 = vmatmul.mubr.f32.gmra.mxu0 %v21_v57 }
  0x2c   :  { %161 = vmatprep.mubr.f32.mxu0 %v25_v58 }
  0x2f   :  { %162 = vmatmul.mubr.f32.gmra.mxu0 %v24_v59 }
  0xe3   :  { %v318_v60 = vpop.f32.mrf.mxu0 }
  0xe5   :  { %v319_v61 = vpop.f32.mrf.mxu0 }
  0xe6   :  { %v320_v63 = vadd.f32 %v319_v61, %v318_v60  ;;  %v384_v0 = vpop.f32.mrf.mxu1 }
  0xe7   :  { %v321_v1 = vpop.f32.mrf.mxu0 }
  0xe8   :  { %v149_v2 = vadd.f32 %v320_v63, %v285_v62  ;;  %v233_v3 = vpop.f32.mrf.mxu1 }
  0xe9   :  { %v322_v4 = vpop.f32.mrf.mxu0 }
  0xea   :  { %v323_v5 = vadd.f32 %v322_v4, %v321_v1  ;;  %v234_v6 = vadd.f32 %v233_v3, %v149_v2  ;;  %v387_v8 = vpop.f32.mrf.mxu1 }
  0xeb   :  { %v324_v7 = vpop.f32.mrf.mxu0 }
  0xec   :  { %v154_v9 = vadd.f32 %v323_v5, %v285_v62  ;;  %vm252_vm1 = vcmp.gt.f32.partialorder %v234_v6, 0.0  ;;  %v256_v10 = vmul.f32 0.1, %v234_v6  ;;  %v243_v16 = vpop.f32.mrf.mxu1 }
  0xed   :  { %v325_v11 = vpop.f32.mrf.mxu0 }
  0xee   :  { %v239_v12 = vadd.f32 %v384_v0, %v154_v9  ;;  %v260_v13 = vsel %vm252_vm1, %v234_v6, %v256_v10  ;;  %v326_v14 = vadd.f32 %v325_v11, %v324_v7 }
  0xef   :  { %265 = vst.msk [vmem:[#allocation2] sm:$0xff] %vm264_vm0, %v260_v13  ;;  %v327_v15 = vpop.f32.mrf.mxu0 }
  0xf0   :  { %vm253_vm2 = vcmp.gt.f32.partialorder %v239_v12, 0.0  ;;  %v257_v17 = vmul.f32 0.1, %v239_v12  ;;  %v159_v18 = vadd.f32 %v326_v14, %v285_v62 }
  0xf1   :  { %v328_v19 = vpop.f32.mrf.mxu0 }
  0xf2   :  { %v261_v20 = vsel %vm253_vm2, %v239_v12, %v257_v17  ;;  %v329_v21 = vadd.f32 %v328_v19, %v327_v15  ;;  %v244_v22 = vadd.f32 %v243_v16, %v159_v18 }
  0xf3   :  { %266 = vst.msk [vmem:[#allocation2 + $0x8] sm:$0xff] %vm264_vm0, %v261_v20 }
  0xf4   :  { %v164_v23 = vadd.f32 %v329_v21, %v285_v62  ;;  %vm254_vm3 = vcmp.gt.f32.partialorder %v244_v22, 0.0  ;;  %v258_v24 = vmul.f32 0.1, %v244_v22 }
  0xf6   :  { %v249_v25 = vadd.f32 %v387_v8, %v164_v23  ;;  %v262_v26 = vsel %vm254_vm3, %v244_v22, %v258_v24 }
  0xf7   :  { %267 = vst.msk [vmem:[#allocation2 + $0x10] sm:$0xff] %vm264_vm0, %v262_v26 }
  0xf8   :  { %vm255_vm4 = vcmp.gt.f32.partialorder %v249_v25, 0.0  ;;  %v259_v27 = vmul.f32 0.1, %v249_v25 }
  0xfa   :  { %v263_v28 = vsel %vm255_vm4, %v249_v25, %v259_v27 }
  0xfb   :  { %268 = vst.msk [vmem:[#allocation2 + $0x18] sm:$0xff] %vm264_vm0, %v263_v28 }
  0xfc   :  { %402 = shalt.err (!%p399_p4)
}
  0xfd   :  { %s414_s26 = smov 128   ;;  %s415_s27 = smov 8  }
  0xfe   :  { %280 = dma.vmem_to_hbm [thread:$0]  %s275_s2, 512, %s629_s3, [#allocation3], %s414_s26, %s414_s26, %s415_s27  }
  0xff   :  { %411 = dma.done.wait [#allocation3], 512  }
 0x100   :  { %412 = vsyncadd [#allocation3], 4294966784 }
 0x101   :  { %284 = vsyncpa [#allocation3], 1 }

</bundles_post_ra>
